<compile_context>
chip_gen: v6e
topology: v6e:2x2x1
jax: 0.10.0
libtpu: 0.0.40
codegen_flags: <defaults>
</compile_context>

<pallas_src>
import jax
import jax.numpy as jnp
from jax.experimental import pallas as pl
from jax.experimental.pallas import tpu as pltpu

# VMEM budget (bytes) for the live, double-buffered pipeline buffers.
# Conservative so a single tile choice is safe across v5e / v6e / v7x.
_VMEM_PIPELINE_BUDGET = 8 * 1024 * 1024
_LANE = 128


def _make_rgbdiff_kernel(T: int):
    def kernel(x_ref, o_ref):
        # x_ref: (Nb, T, chw_tile) VMEM tile; o_ref: (Nb, T-1, chw_tile) VMEM tile.
        # Row-wise statically unrolled diff: each step is an aligned VPU subtract
        # on a (Nb, 1, chw_tile) slab (static slices -> views, no rotate/copy).
        for t in range(T - 1):
            o_ref[:, t : t + 1, :] = (
                x_ref[:, t + 1 : t + 2, :] - x_ref[:, t : t + 1, :]
            )

    return kernel


def _round_up(x: int, m: int) -> int:
    return ((x + m - 1) // m) * m


def _choose_tiling(N: int, T: int, chw: int, dsize: int):
    """Pick (Nb, chw_tile, chw_padded, n_chw_tiles) under the VMEM budget."""
    rows = 2 * T - 1                      # input rows (T) + output rows (T-1)
    per_lane_bytes = 2 * rows * dsize     # double-buffered, per lane, per batch elem

    # Largest lane-multiple tile that fits the budget at Nb = 1.
    cap = max(_LANE, (_VMEM_PIPELINE_BUDGET // per_lane_bytes) // _LANE * _LANE)

    if chw <= cap:
        chw_tile = _round_up(chw, _LANE)
        chw_padded = chw_tile
    else:
        chw_tile = cap
        chw_padded = _round_up(chw, chw_tile)
    n_chw = chw_padded // chw_tile

    # Fold batch elements into one block so each DMA is big enough to amortize
    # per-step overhead, but keep >= 2 grid steps when possible so v7x's two
    # TensorCores both get work.
    nb = 1
    for d in range(N, 0, -1):
        if N % d != 0:
            continue
        if d * per_lane_bytes * chw_tile > _VMEM_PIPELINE_BUDGET:
            continue
        if (N // d) * n_chw >= 2 or d == 1:
            nb = d
            break
    return nb, chw_tile, chw_padded, n_chw


def rgb_diff(image: jax.Array) -> jax.Array:
    """image: (N, T, C, H, W) -> (N, T-1, C, H, W), diff along the T axis."""
    N, T, C, H, W = image.shape
    assert T >= 2, "need at least 2 frames to diff"
    # NOTE: the subtraction is done in the input dtype (matches the PyTorch
    # module). For uint8 frame data cast to a signed/float dtype before calling
    # if signed diffs are intended.
    chw = C * H * W
    dsize = jnp.dtype(image.dtype).itemsize
    nb, chw_tile, chw_padded, n_chw = _choose_tiling(N, T, chw, dsize)

    x2d = image.reshape(N, T, chw)
    if chw_padded != chw:
        # Pad lanes up to the tile boundary (diff of zero padding is zero).
        x2d = jnp.pad(x2d, ((0, 0), (0, 0), (0, chw_padded - chw)))

    grid = (N // nb, n_chw)

    cost = pl.CostEstimate(
        flops=N * (T - 1) * chw_padded,
        transcendentals=0,
        bytes_accessed=(2 * T - 1) * N * chw_padded * dsize,
    )

    out = pl.pallas_call(
        _make_rgbdiff_kernel(T),
        out_shape=jax.ShapeDtypeStruct((N, T - 1, chw_padded), image.dtype),
        grid_spec=pltpu.PrefetchScalarGridSpec(
            num_scalar_prefetch=0,
            grid=grid,
            in_specs=[pl.BlockSpec((nb, T, chw_tile), lambda n, c: (n, 0, c))],
            out_specs=pl.BlockSpec((nb, T - 1, chw_tile), lambda n, c: (n, 0, c)),
        ),
        compiler_params=pltpu.CompilerParams(
            dimension_semantics=("parallel", "parallel"),
        ),
        cost_estimate=cost,
    )(x2d)

    if chw_padded != chw:
        out = out[:, :, :chw]
    return out.reshape(N, T - 1, C, H, W)


if __name__ == "__main__":
    key = jax.random.PRNGKey(0)
    N, T, C, H, W = 2, 8, 3, 16, 16
    image = jax.random.normal(key, (N, T, C, H, W), dtype=jnp.float32)

    result = jax.block_until_ready(rgb_diff(image))

    # Reference check (plain JAX, matches the PyTorch loop semantics).
    ref = image[:, 1:] - image[:, :-1]
    assert result.shape == (N, T - 1, C, H, W)
    assert jnp.allclose(result, ref, atol=1e-6, rtol=1e-6)

    print("KERNEL_OK")
</pallas_src>

<mosaic_0001>
module attributes {stable_mosaic.version = 11 : i64} {
  func.func @kernel(%arg0: i32, %arg1: i32, %arg2: memref<1x8x768xf32, #tpu.memory_space<vmem>>, %arg3: memref<1x7x768xf32, #tpu.memory_space<vmem>>) attributes {dimension_semantics = [#tpu.dimension_semantics<parallel>, #tpu.dimension_semantics<parallel>], iteration_bounds = array<i64: 2, 1>, scalar_prefetch = 0 : i64, scratch_operands = 0 : i64, tpu.core_type = #tpu.core_type<tc>, window_params = [{transform_indices = @transform_0, window_bounds = array<i64: 1, 8, 768>}, {transform_indices = @transform_1, window_bounds = array<i64: 1, 7, 768>}]} {
    %c0 = arith.constant 0 : index
    %c1 = arith.constant 1 : index
    %c0_0 = arith.constant 0 : index
    %0 = vector.load %arg2[%c0, %c1, %c0_0] : memref<1x8x768xf32, #tpu.memory_space<vmem>>, vector<1x1x768xf32>
    %c0_1 = arith.constant 0 : index
    %c0_2 = arith.constant 0 : index
    %c0_3 = arith.constant 0 : index
    %1 = vector.load %arg2[%c0_1, %c0_2, %c0_3] : memref<1x8x768xf32, #tpu.memory_space<vmem>>, vector<1x1x768xf32>
    %2 = arith.subf %0, %1 : vector<1x1x768xf32>
    %c0_4 = arith.constant 0 : index
    %c0_5 = arith.constant 0 : index
    %c0_6 = arith.constant 0 : index
    %3 = vector.load %arg3[%c0_4, %c0_5, %c0_6] : memref<1x7x768xf32, #tpu.memory_space<vmem>>, vector<1x1x768xf32>
    tpu.vector_store %arg3[%c0_4, %c0_5, %c0_6], %2 {strides = array<i32>} : memref<1x7x768xf32, #tpu.memory_space<vmem>>, vector<1x1x768xf32>,
    %c0_7 = arith.constant 0 : index
    %c2 = arith.constant 2 : index
    %c0_8 = arith.constant 0 : index
    %4 = vector.load %arg2[%c0_7, %c2, %c0_8] : memref<1x8x768xf32, #tpu.memory_space<vmem>>, vector<1x1x768xf32>
    %c0_9 = arith.constant 0 : index
    %c1_10 = arith.constant 1 : index
    %c0_11 = arith.constant 0 : index
    %5 = vector.load %arg2[%c0_9, %c1_10, %c0_11] : memref<1x8x768xf32, #tpu.memory_space<vmem>>, vector<1x1x768xf32>
    %6 = arith.subf %4, %5 : vector<1x1x768xf32>
    %c0_12 = arith.constant 0 : index
    %c1_13 = arith.constant 1 : index
    %c0_14 = arith.constant 0 : index
    %7 = vector.load %arg3[%c0_12, %c1_13, %c0_14] : memref<1x7x768xf32, #tpu.memory_space<vmem>>, vector<1x1x768xf32>
    tpu.vector_store %arg3[%c0_12, %c1_13, %c0_14], %6 {strides = array<i32>} : memref<1x7x768xf32, #tpu.memory_space<vmem>>, vector<1x1x768xf32>,
    %c0_15 = arith.constant 0 : index
    %c3 = arith.constant 3 : index
    %c0_16 = arith.constant 0 : index
    %8 = vector.load %arg2[%c0_15, %c3, %c0_16] : memref<1x8x768xf32, #tpu.memory_space<vmem>>, vector<1x1x768xf32>
    %c0_17 = arith.constant 0 : index
    %c2_18 = arith.constant 2 : index
    %c0_19 = arith.constant 0 : index
    %9 = vector.load %arg2[%c0_17, %c2_18, %c0_19] : memref<1x8x768xf32, #tpu.memory_space<vmem>>, vector<1x1x768xf32>
    %10 = arith.subf %8, %9 : vector<1x1x768xf32>
    %c0_20 = arith.constant 0 : index
    %c2_21 = arith.constant 2 : index
    %c0_22 = arith.constant 0 : index
    %11 = vector.load %arg3[%c0_20, %c2_21, %c0_22] : memref<1x7x768xf32, #tpu.memory_space<vmem>>, vector<1x1x768xf32>
    tpu.vector_store %arg3[%c0_20, %c2_21, %c0_22], %10 {strides = array<i32>} : memref<1x7x768xf32, #tpu.memory_space<vmem>>, vector<1x1x768xf32>,
    %c0_23 = arith.constant 0 : index
    %c4 = arith.constant 4 : index
    %c0_24 = arith.constant 0 : index
    %12 = vector.load %arg2[%c0_23, %c4, %c0_24] : memref<1x8x768xf32, #tpu.memory_space<vmem>>, vector<1x1x768xf32>
    %c0_25 = arith.constant 0 : index
    %c3_26 = arith.constant 3 : index
    %c0_27 = arith.constant 0 : index
    %13 = vector.load %arg2[%c0_25, %c3_26, %c0_27] : memref<1x8x768xf32, #tpu.memory_space<vmem>>, vector<1x1x768xf32>
    %14 = arith.subf %12, %13 : vector<1x1x768xf32>
    %c0_28 = arith.constant 0 : index
    %c3_29 = arith.constant 3 : index
    %c0_30 = arith.constant 0 : index
    %15 = vector.load %arg3[%c0_28, %c3_29, %c0_30] : memref<1x7x768xf32, #tpu.memory_space<vmem>>, vector<1x1x768xf32>
    tpu.vector_store %arg3[%c0_28, %c3_29, %c0_30], %14 {strides = array<i32>} : memref<1x7x768xf32, #tpu.memory_space<vmem>>, vector<1x1x768xf32>,
    %c0_31 = arith.constant 0 : index
    %c5 = arith.constant 5 : index
    %c0_32 = arith.constant 0 : index
    %16 = vector.load %arg2[%c0_31, %c5, %c0_32] : memref<1x8x768xf32, #tpu.memory_space<vmem>>, vector<1x1x768xf32>
    %c0_33 = arith.constant 0 : index
    %c4_34 = arith.constant 4 : index
    %c0_35 = arith.constant 0 : index
    %17 = vector.load %arg2[%c0_33, %c4_34, %c0_35] : memref<1x8x768xf32, #tpu.memory_space<vmem>>, vector<1x1x768xf32>
    %18 = arith.subf %16, %17 : vector<1x1x768xf32>
    %c0_36 = arith.constant 0 : index
    %c4_37 = arith.constant 4 : index
    %c0_38 = arith.constant 0 : index
    %19 = vector.load %arg3[%c0_36, %c4_37, %c0_38] : memref<1x7x768xf32, #tpu.memory_space<vmem>>, vector<1x1x768xf32>
    tpu.vector_store %arg3[%c0_36, %c4_37, %c0_38], %18 {strides = array<i32>} : memref<1x7x768xf32, #tpu.memory_space<vmem>>, vector<1x1x768xf32>,
    %c0_39 = arith.constant 0 : index
    %c6 = arith.constant 6 : index
    %c0_40 = arith.constant 0 : index
    %20 = vector.load %arg2[%c0_39, %c6, %c0_40] : memref<1x8x768xf32, #tpu.memory_space<vmem>>, vector<1x1x768xf32>
    %c0_41 = arith.constant 0 : index
    %c5_42 = arith.constant 5 : index
    %c0_43 = arith.constant 0 : index
    %21 = vector.load %arg2[%c0_41, %c5_42, %c0_43] : memref<1x8x768xf32, #tpu.memory_space<vmem>>, vector<1x1x768xf32>
    %22 = arith.subf %20, %21 : vector<1x1x768xf32>
    %c0_44 = arith.constant 0 : index
    %c5_45 = arith.constant 5 : index
    %c0_46 = arith.constant 0 : index
    %23 = vector.load %arg3[%c0_44, %c5_45, %c0_46] : memref<1x7x768xf32, #tpu.memory_space<vmem>>, vector<1x1x768xf32>
    tpu.vector_store %arg3[%c0_44, %c5_45, %c0_46], %22 {strides = array<i32>} : memref<1x7x768xf32, #tpu.memory_space<vmem>>, vector<1x1x768xf32>,
    %c0_47 = arith.constant 0 : index
    %c7 = arith.constant 7 : index
    %c0_48 = arith.constant 0 : index
    %24 = vector.load %arg2[%c0_47, %c7, %c0_48] : memref<1x8x768xf32, #tpu.memory_space<vmem>>, vector<1x1x768xf32>
    %c0_49 = arith.constant 0 : index
    %c6_50 = arith.constant 6 : index
    %c0_51 = arith.constant 0 : index
    %25 = vector.load %arg2[%c0_49, %c6_50, %c0_51] : memref<1x8x768xf32, #tpu.memory_space<vmem>>, vector<1x1x768xf32>
    %26 = arith.subf %24, %25 : vector<1x1x768xf32>
    %c0_52 = arith.constant 0 : index
    %c6_53 = arith.constant 6 : index
    %c0_54 = arith.constant 0 : index
    %27 = vector.load %arg3[%c0_52, %c6_53, %c0_54] : memref<1x7x768xf32, #tpu.memory_space<vmem>>, vector<1x1x768xf32>
    tpu.vector_store %arg3[%c0_52, %c6_53, %c0_54], %26 {strides = array<i32>} : memref<1x7x768xf32, #tpu.memory_space<vmem>>, vector<1x1x768xf32>,
    return
  }
  func.func @transform_0(%arg0: i32, %arg1: i32) -> (i32, i32, i32) {
    %c0_i32 = arith.constant 0 : i32
    %c0_i32_0 = arith.constant 0 : i32
    return %arg0, %c0_i32, %arg1 : i32, i32, i32
  }
  func.func @transform_1(%arg0: i32, %arg1: i32) -> (i32, i32, i32) {
    %c0_i32 = arith.constant 0 : i32
    %c0_i32_0 = arith.constant 0 : i32
    return %arg0, %c0_i32, %arg1 : i32, i32, i32
  }
}

</mosaic_0001>

<bundles_post_ra>
// kernel: tpu_custom_call.1
= control target key start
LH: loop header
LB: loop body
LE: loop exit
PB: predicated region body
PF: predicated region fallthrough
CT: control target
= control target key end

     0   :  { %6 = vsyncpa [#allocation3], 0  ;;  %s707_s0 = inlined_call_operand.hbm [shape: f32[2,8,768], index: 0, kind: input, shape index: {}]   ;;  %s708_s1 = inlined_call_operand.vmem [shape: f32[2,7,768], index: 1, kind: output, shape index: {}]  }
   0x1   :  { %8 = vsyncpa [#allocation3 + $0x1], 0  ;;  %s535_s6 = smov 0   ;;  %s537_s7 = smov 0  }
   0x2   :  { %s539_s8 = smov 0   ;;  %s541_s9 = smov 0  }
   0x3   :  { %s543_s10 = smov 0   ;;  %s545_s11 = smov 0  }
   0x4 LB: > { %s338_s12 = sadd.s32 4294967295, %s522_s11   ;;  %s26_s13 = sadd.s32 1, %s518_s10  ;;  %s522_s11 = sphi %s545_s11, %s14_s11   ;;  %s518_s10 = sphi %s543_s10, %s717_s10   ;;  %s514_s9 = sphi %s541_s9, %s716_s9   ;;  %s510_s8 = sphi %s539_s8, %s715_s8   ;;  %s506_s7 = sphi %s537_s7, %s714_s7   ;;  %s502_s6 = sphi %s535_s6, %s713_s6  }
   0x5   : > { %p28_p0 = scmp.ge.s32.totalorder %s26_s13, 2  ;;  %s35_s14 = sadd.s32 1, %s510_s8 }
   0x6   : > { %p42_p1 = scmp.ne.s32.totalorder %s510_s8, %s506_s7  ;;  %p43_p2 = scmp.eq.s32.totalorder %s522_s11, 0 }
   0x7   : > { %s719_s13 = smov (%p28_p0, %s26_s13), 0  ;;  %p48_p4 = scmp.ne.s32.totalorder %s506_s7, %s502_s6 }
   0x8   : > { %p44_p3 = por %p43_p2, %p42_p1  ;;  %s30_s15 = ssub.s32 %s518_s10, %s719_s13 }
   0x9   : > { %p49_p5 = scmp.eq.s32.totalorder %s338_s12, 0  ;;  %p33_p6 = scmp.eq.s32.totalorder %s30_s15, 0 }
   0xa   : > { %p395_p8 = scmp.lt.s32.totalorder %s522_s11, 2  ;;  %s100_s18 = sand.u32 1, %s510_s8  }
   0xb   : > { %p574_p7 = por %p49_p5, %p48_p4  ;;  %s386_s19 = smul.u32 768, %s518_s10 }
   0xc   : > { %s580_s17 = scalar_select %p33_p6, %s510_s8, %s35_s14  }
   0xd   : > { %s385_s20 = smul.u32 48, %s100_s18  ;;  %s112_s23 = scalar_lea.hbm %s707_s0, %s386_s19 }
   0xe   : > { %p587_p9 = pnand %p395_p8, %p44_p3  ;;  %p343_p10 = scmp.ge.s32.totalorder %s522_s11, 1 }
   0xf   : > { %s104_s25 = scalar_lea.vmem [#allocation2], %s385_s20  ;;  %p119_p11 = scmp.lt.s32.totalorder %s522_s11, 3 }
  0x10   : > { %s114_s26 = sshll.u32 %s104_s25, 4  ;;  %s101_s27 = scalar_lea.sflag [#allocation3], %s100_s18  ;;  %s115_s26 = int_to_ptr.vmem [resolvable:$true] %s114_s26 }
  0x11   : > { %p446_p12 = pneg %p587_p9  ;;  %s457_s28 = scalar_lea.vmem %s115_s26, 768 }
  0x12   : > { %p458_p13 = scmp.ne.s32.totalorder %s115_s26, %s457_s28  ;;  %s524_s29 = smov [#allocation2]  }
  0x13   : > { %s462_s30 = sshll.u32 %s524_s29, 4  ;;  %s463_s30 = int_to_ptr.vmem [resolvable:$false] %s462_s30 }
  0x14   : > { %p460_p0 = pnand %p458_p13, %p446_p12  ;;  %s464_s2 = scalar_lea.vmem %s463_s30, 1536 }
  0x15   : > { %p465_p2 = scmp.lt.s32.totalorder %s115_s26, %s463_s30  ;;  %p466_p3 = scmp.lt.s32.totalorder %s464_s2, %s457_s28 }
  0x16   : > { %p461_p1 = pneg %p460_p0 }
  0x17   : > { %p467_p4 = por %p466_p3, %p465_p2 }
  0x19   : > { %p468_p5 = pnand %p467_p4, %p461_p1 }
  0x1b   : > { %471 = shalt.err (!%p468_p5)
}
  0x1c   : > { %394 = dma.hbm_to_vmem [thread:$0]  (!%p587_p9), %s112_s23, 768, %s115_s26, %s101_s27  }
  0x1d   : > { %p120_p6 = pnand %p343_p10, %p119_p11 }
  0x1e   : > { %s125_s3 = sand.u32 (!%p120_p6), 1, %s506_s7  }
  0x1f   : > { %123 = sbr.rel (%p120_p6) target bundleno = 62 (0x3e), region = 24  ;;  %s126_s5 = scalar_lea.sflag (!%p120_p6), [#allocation3], %s125_s3 }
  0x20   : > { %s387_s4 = smul.u32 (!%p120_p6), 48, %s125_s3 }
  0x22   : > { %s602_s6 = scalar_lea.vmem (!%p120_p6), [#allocation2], %s387_s4 }
  0x24   : > { %497 = dma.done.wait (%p574_p7), %s126_s5, 768  }
  0x25   : > { %499 = vsyncadd (%p574_p7), %s126_s5, 4294966528  ;;  %p154_p8 = scmp.lt.s32.totalorder %s514_s9, 1  ;;  %v171_v0 = vlaneseq  ;;  %v345_v2 = vld [vmem:[%s602_s6 + $0x1] ss:$8 sm:$0xf] }
  0x26   : > { %v346_v3 = vld [vmem:[%s602_s6 + $0x1] ss:$8 sm:$0x30]  ;;  %v167_v5 = vld [vmem:[%s602_s6] ss:$8 sm:$0xf] }
  0x27   : > { %s721_s9 = smov (!%p154_p8, %s514_s9), 1  ;;  %vm610_vm0 = vcmp.lt.s32.totalorder %v171_v0, 768  ;;  %v166_v4 = vor.u32 %v346_v3, %v345_v2  ;;  %v168_v6 = vld [vmem:[%s602_s6] ss:$8 sm:$0x30] }
  0x28   : > { %s388_s12 = smul.u32 48, %s721_s9  ;;  %v169_v7 = vor.u32 %v168_v6, %v167_v5  ;;  %v347_v8 = vld [vmem:[%s602_s6 + $0x2] ss:$8 sm:$0xf] }
  0x29   : > { %v348_v9 = vld [vmem:[%s602_s6 + $0x2] ss:$8 sm:$0x30]  ;;  %v349_v11 = vld [vmem:[%s602_s6 + $0x1] ss:$8 sm:$0xf] }
  0x2a   : > { %s623_s9 = scalar_lea.vmem %s708_s1, %s388_s12  ;;  %v180_v10 = vor.u32 %v348_v9, %v347_v8  ;;  %v350_v12 = vld [vmem:[%s602_s6 + $0x1] ss:$8 sm:$0x30]  ;;  %v170_v13 = vsub.f32 %v166_v4, %v169_v7  ;;  %v353_v15 = vld [vmem:[%s602_s6 + $0x3] ss:$8 sm:$0xf] }
  0x2b   : > { %v183_v14 = vor.u32 %v350_v12, %v349_v11  ;;  %v354_v16 = vld [vmem:[%s602_s6 + $0x3] ss:$8 sm:$0x30]  ;;  %v355_v18 = vld [vmem:[%s602_s6 + $0x2] ss:$8 sm:$0xf] }
  0x2c   : > { %v191_v17 = vor.u32 %v354_v16, %v353_v15  ;;  %v356_v19 = vld [vmem:[%s602_s6 + $0x2] ss:$8 sm:$0x30]  ;;  %175 = vst.msk [vmem:[%s623_s9] ss:$8 sm:$0xf] %vm610_vm0, %v170_v13 }
  0x2d   : > { %176 = vst.msk [vmem:[%s623_s9] ss:$8 sm:$0x30] %vm610_vm0, %v170_v13  ;;  %v184_v20 = vsub.f32 %v180_v10, %v183_v14  ;;  %v194_v21 = vor.u32 %v356_v19, %v355_v18  ;;  %v359_v22 = vld [vmem:[%s602_s6 + $0x4] ss:$8 sm:$0xf] }
  0x2e   : > { %v360_v23 = vld [vmem:[%s602_s6 + $0x4] ss:$8 sm:$0x30]  ;;  %v361_v25 = vld [vmem:[%s602_s6 + $0x3] ss:$8 sm:$0xf] }
  0x2f   : > { %v202_v24 = vor.u32 %v360_v23, %v359_v22  ;;  %v362_v26 = vld [vmem:[%s602_s6 + $0x3] ss:$8 sm:$0x30]  ;;  %351 = vst.msk [vmem:[%s623_s9 + $0x1] ss:$8 sm:$0xf] %vm610_vm0, %v184_v20  ;;  %v195_v27 = vsub.f32 %v191_v17, %v194_v21 }
  0x30   : > { %352 = vst.msk [vmem:[%s623_s9 + $0x1] ss:$8 sm:$0x30] %vm610_vm0, %v184_v20  ;;  %v205_v28 = vor.u32 %v362_v26, %v361_v25  ;;  %v365_v29 = vld [vmem:[%s602_s6 + $0x5] ss:$8 sm:$0xf] }
  0x31   : > { %v366_v30 = vld [vmem:[%s602_s6 + $0x5] ss:$8 sm:$0x30]  ;;  %v367_v32 = vld [vmem:[%s602_s6 + $0x4] ss:$8 sm:$0xf] }
  0x32   : > { %v213_v31 = vor.u32 %v366_v30, %v365_v29  ;;  %v368_v33 = vld [vmem:[%s602_s6 + $0x4] ss:$8 sm:$0x30]  ;;  %357 = vst.msk [vmem:[%s623_s9 + $0x2] ss:$8 sm:$0xf] %vm610_vm0, %v195_v27  ;;  %v206_v34 = vsub.f32 %v202_v24, %v205_v28 }
  0x33   : > { %358 = vst.msk [vmem:[%s623_s9 + $0x2] ss:$8 sm:$0x30] %vm610_vm0, %v195_v27  ;;  %v216_v35 = vor.u32 %v368_v33, %v367_v32  ;;  %v371_v36 = vld [vmem:[%s602_s6 + $0x6] ss:$8 sm:$0xf] }
  0x34   : > { %v372_v37 = vld [vmem:[%s602_s6 + $0x6] ss:$8 sm:$0x30]  ;;  %v373_v39 = vld [vmem:[%s602_s6 + $0x5] ss:$8 sm:$0xf] }
  0x35   : > { %v224_v38 = vor.u32 %v372_v37, %v371_v36  ;;  %v374_v40 = vld [vmem:[%s602_s6 + $0x5] ss:$8 sm:$0x30]  ;;  %363 = vst.msk [vmem:[%s623_s9 + $0x3] ss:$8 sm:$0xf] %vm610_vm0, %v206_v34  ;;  %v217_v41 = vsub.f32 %v213_v31, %v216_v35 }
  0x36   : > { %364 = vst.msk [vmem:[%s623_s9 + $0x3] ss:$8 sm:$0x30] %vm610_vm0, %v206_v34  ;;  %v227_v42 = vor.u32 %v374_v40, %v373_v39  ;;  %v377_v43 = vld [vmem:[%s602_s6 + $0x7] ss:$8 sm:$0xf] }
  0x37   : > { %v378_v44 = vld [vmem:[%s602_s6 + $0x7] ss:$8 sm:$0x30]  ;;  %v379_v46 = vld [vmem:[%s602_s6 + $0x6] ss:$8 sm:$0xf] }
  0x38   : > { %v235_v45 = vor.u32 %v378_v44, %v377_v43  ;;  %v380_v47 = vld [vmem:[%s602_s6 + $0x6] ss:$8 sm:$0x30]  ;;  %369 = vst.msk [vmem:[%s623_s9 + $0x4] ss:$8 sm:$0xf] %vm610_vm0, %v217_v41  ;;  %v228_v48 = vsub.f32 %v224_v38, %v227_v42 }
  0x39   : > { %370 = vst.msk [vmem:[%s623_s9 + $0x4] ss:$8 sm:$0x30] %vm610_vm0, %v217_v41  ;;  %v238_v49 = vor.u32 %v380_v47, %v379_v46 }
  0x3a   : > { %375 = vst.msk [vmem:[%s623_s9 + $0x5] ss:$8 sm:$0xf] %vm610_vm0, %v228_v48  ;;  %376 = vst.msk [vmem:[%s623_s9 + $0x5] ss:$8 sm:$0x30] %vm610_vm0, %v228_v48 }
  0x3b   : > { %v239_v50 = vsub.f32 %v235_v45, %v238_v49 }
  0x3d   : > { %381 = vst.msk [vmem:[%s623_s9 + $0x6] ss:$8 sm:$0xf] %vm610_vm0, %v239_v50  ;;  %382 = vst.msk [vmem:[%s623_s9 + $0x6] ss:$8 sm:$0x30] %vm610_vm0, %v239_v50 }
  0x3e PF: > { %s14_s11 = sadd.s32 1, %s522_s11   ;;  %s713_s6 = smov %s506_s7 }
  0x3f   : > { %p11_p7 = scmp.ge.s32.totalorder %s14_s11, 4   ;;  %s714_s7 = smov %s510_s8 }
  0x40   : > { %s715_s8 = smov %s580_s17  ;;  %s716_s9 = smov %s518_s10 }
  0x41   : > { %s717_s10 = smov %s719_s13  ;;  %13 = sbr.rel (!%p11_p7) target bundleno = 4 (0x4), region = 77 }
  0x46   :  { %273 = vsyncpa [#allocation3], 1 }
  0x47   :  { %275 = vsyncpa [#allocation3 + $0x1], 1 }

</bundles_post_ra>
